<compile_context>
chip_gen: v5e
topology: v5e:2x2
jax: 0.10.0
libtpu: 0.0.40
codegen_flags: <defaults>
</compile_context>

<pallas_src>
import math

import jax
import jax.numpy as jnp
from jax import lax
from jax.experimental import pallas as pl
from jax.experimental.pallas import tpu as pltpu


def _round_up(n, m):
    return ((n + m - 1) // m) * m


def _make_kernel(noisy, compute_dtype):
    """Build the fused NoisyLinear kernel body.

    noisy=True  -> refs: x, w_mu, w_sigma, w_eps, bias, out, acc
    noisy=False -> refs: x, w_mu, bias, out, acc
    """

    def kernel(*refs):
        if noisy:
            x_ref, wmu_ref, wsig_ref, weps_ref, b_ref, o_ref, acc_ref = refs
        else:
            x_ref, wmu_ref, b_ref, o_ref, acc_ref = refs

        k = pl.program_id(2)

        @pl.when(k == 0)
        def _():
            acc_ref[...] = jnp.zeros_like(acc_ref)

        # Fused noisy weight tile (VPU), [tn, tk].
        if noisy:
            w = wmu_ref[...] + wsig_ref[...] * weps_ref[...]
        else:
            w = wmu_ref[...]
        x = x_ref[...]  # [tb, tk]

        if compute_dtype is not None:
            # bf16 MXU operands on v6e/v7x; accumulation stays f32.
            w = w.astype(compute_dtype)
            x = x.astype(compute_dtype)

        # y += x @ w.T without materializing a transpose: contract dim 1 of x
        # with dim 1 of w (MXU native trans_b contraction).
        acc_ref[...] += lax.dot_general(
            x, w,
            dimension_numbers=(((1,), (1,)), ((), ())),
            preferred_element_type=jnp.float32)

        @pl.when(k == pl.num_programs(2) - 1)
        def _():
            o_ref[...] = (acc_ref[...] + b_ref[...]).astype(o_ref.dtype)

    return kernel


def noisy_linear_forward(x, params, training=True, compute_dtype=None,
                         tb_max=256, tn_max=256, tk_max=512):
    """Pallas forward of NoisyLinear.

    x:      [B, in_features] float32
    params: dict with weight_mu/weight_sigma/weight_epsilon [out, in],
            bias_mu/bias_sigma/bias_epsilon [out].
    compute_dtype: None (f32 MXU) or jnp.bfloat16 for v6e/v7x MXU throughput.
    """
    B, in_f = x.shape
    out_f = params["weight_mu"].shape[0]
    out_dtype = x.dtype

    # Hoisted bias fuse: tiny O(out) op, done once in the wrapper instead of
    # per grid step inside the kernel.
    if training:
        bias = params["bias_mu"] + params["bias_sigma"] * params["bias_epsilon"]
    else:
        bias = params["bias_mu"]

    # Tile sizes: lane-dense (multiples of 128 on the last dim, 8 on sublane),
    # sized so 2x-buffered x + (1 or 3) weight streams + out stay well under
    # the v7x 32 MiB scoped-VMEM budget.
    tb = min(tb_max, _round_up(B, 8))
    tn = min(tn_max, _round_up(out_f, 128))
    tk = min(tk_max, _round_up(in_f, 128))

    Bp = _round_up(B, tb)
    Np = _round_up(out_f, tn)
    Kp = _round_up(in_f, tk)

    def pad2(a, rows, cols):
        return jnp.pad(a, ((0, rows - a.shape[0]), (0, cols - a.shape[1])))

    xp = pad2(x, Bp, Kp)
    bp = pad2(bias.reshape(1, out_f), 1, Np)

    weights = [pad2(params["weight_mu"], Np, Kp)]
    if training:
        weights.append(pad2(params["weight_sigma"], Np, Kp))
        weights.append(pad2(params["weight_epsilon"], Np, Kp))

    grid = (Bp // tb, Np // tn, Kp // tk)

    x_spec = pl.BlockSpec((tb, tk), lambda i, j, k: (i, k))
    w_spec = pl.BlockSpec((tn, tk), lambda i, j, k: (j, k))
    b_spec = pl.BlockSpec((1, tn), lambda i, j, k: (0, j))
    o_spec = pl.BlockSpec((tb, tn), lambda i, j, k: (i, j))

    kernel = _make_kernel(noisy=training, compute_dtype=compute_dtype)

    out_padded = pl.pallas_call(
        kernel,
        out_shape=jax.ShapeDtypeStruct((Bp, Np), out_dtype),
        grid_spec=pltpu.PrefetchScalarGridSpec(
            num_scalar_prefetch=0,
            grid=grid,
            in_specs=[x_spec] + [w_spec] * len(weights) + [b_spec],
            out_specs=o_spec,
            scratch_shapes=[pltpu.VMEM((tb, tn), jnp.float32)],
        ),
        compiler_params=pltpu.CompilerParams(
            dimension_semantics=("parallel", "parallel", "arbitrary"),
            vmem_limit_bytes=48 << 20,  # safe on v5e/v6e (128 MiB) and v7x (64 MiB)
        ),
    )(xp, *weights, bp)

    return out_padded[:B, :out_f]


def _scale_noise(key, size):
    # PyTorch _scale_noise: sign(x) * sqrt(|x|) with x ~ N(0, 1)
    x = jax.random.normal(key, (size,), dtype=jnp.float32)
    return jnp.sign(x) * jnp.sqrt(jnp.abs(x))


def init_noisy_linear(key, in_features, out_features, std_init=0.5):
    """Deterministic parameter init mirroring NoisyLinear.__init__ semantics."""
    k_wmu, k_bmu, k_ein, k_eout = jax.random.split(key, 4)
    mu_range = 1.0 / math.sqrt(in_features)

    weight_mu = jax.random.uniform(
        k_wmu, (out_features, in_features), jnp.float32, -mu_range, mu_range)
    weight_sigma = jnp.full((out_features, in_features),
                            std_init / math.sqrt(in_features), jnp.float32)
    bias_mu = jax.random.uniform(
        k_bmu, (out_features,), jnp.float32, -mu_range, mu_range)
    bias_sigma = jnp.full((out_features,),
                          std_init / math.sqrt(out_features), jnp.float32)

    # reset_noise(): factored Gaussian noise, eps_w = eps_out (x) eps_in
    epsilon_in = _scale_noise(k_ein, in_features)
    epsilon_out = _scale_noise(k_eout, out_features)
    weight_epsilon = jnp.outer(epsilon_out, epsilon_in)
    bias_epsilon = epsilon_out

    return {
        "weight_mu": weight_mu,
        "weight_sigma": weight_sigma,
        "weight_epsilon": weight_epsilon,
        "bias_mu": bias_mu,
        "bias_sigma": bias_sigma,
        "bias_epsilon": bias_epsilon,
    }


if __name__ == "__main__":
    key = jax.random.PRNGKey(0)
    k_param, k_x = jax.random.split(key)

    batch, in_features, out_features = 8, 32, 24
    params = init_noisy_linear(k_param, in_features, out_features, std_init=0.5)
    x = jax.random.normal(k_x, (batch, in_features), dtype=jnp.float32)

    # Pallas kernel: training path (noisy weights) and dedicated eval path.
    y_train = noisy_linear_forward(x, params, training=True)
    y_eval = noisy_linear_forward(x, params, training=False)
    # Optional bf16-MXU variant (v6e/v7x lever); f32 accumulation preserved.
    y_train_bf16 = noisy_linear_forward(x, params, training=True,
                                        compute_dtype=jnp.bfloat16)
    jax.block_until_ready((y_train, y_eval, y_train_bf16))

    # Pure-JAX reference check
    w_noisy = params["weight_mu"] + params["weight_sigma"] * params["weight_epsilon"]
    b_noisy = params["bias_mu"] + params["bias_sigma"] * params["bias_epsilon"]
    ref_train = x @ w_noisy.T + b_noisy
    ref_eval = x @ params["weight_mu"].T + params["bias_mu"]

    assert y_train.shape == (batch, out_features)
    assert jnp.allclose(y_train, ref_train, atol=1e-5, rtol=1e-5)
    assert jnp.allclose(y_eval, ref_eval, atol=1e-5, rtol=1e-5)
    assert jnp.allclose(y_train_bf16, ref_train, atol=2e-2, rtol=2e-2)
    print("KERNEL_OK")
</pallas_src>

<mosaic_0001>
module attributes {stable_mosaic.version = 11 : i64} {
  func.func @kernel(%arg0: i32, %arg1: i32, %arg2: i32, %arg3: memref<8x128xf32, #tpu.memory_space<vmem>>, %arg4: memref<128x128xf32, #tpu.memory_space<vmem>>, %arg5: memref<128x128xf32, #tpu.memory_space<vmem>>, %arg6: memref<128x128xf32, #tpu.memory_space<vmem>>, %arg7: memref<1x128xf32, #tpu.memory_space<vmem>>, %arg8: memref<8x128xf32, #tpu.memory_space<vmem>>, %arg9: memref<8x128xf32, #tpu.memory_space<vmem>>) attributes {dimension_semantics = [#tpu.dimension_semantics<parallel>, #tpu.dimension_semantics<parallel>, #tpu.dimension_semantics<arbitrary>], iteration_bounds = array<i64: 1, 1, 1>, scalar_prefetch = 0 : i64, scratch_operands = 1 : i64, tpu.core_type = #tpu.core_type<tc>, window_params = [{transform_indices = @transform_0, window_bounds = array<i64: 8, 128>}, {transform_indices = @transform_1, window_bounds = array<i64: 128, 128>}, {transform_indices = @transform_2, window_bounds = array<i64: 128, 128>}, {transform_indices = @transform_3, window_bounds = array<i64: 128, 128>}, {transform_indices = @transform_4, window_bounds = array<i64: 1, 128>}, {transform_indices = @transform_5, window_bounds = array<i64: 8, 128>}]} {
    %c0_i32 = arith.constant 0 : i32
    %0 = arith.cmpi eq, %arg2, %c0_i32 : i32
    %1 = arith.extui %0 : i1 to i32
    %c0_i32_0 = arith.constant 0 : i32
    %2 = arith.cmpi ne, %1, %c0_i32_0 : i32
    scf.if %2 {
      %cst_14 = arith.constant 0.000000e+00 : f32
      %16 = vector.broadcast %cst_14 : f32 to vector<8x128xf32>
      %c0_15 = arith.constant 0 : index
      %c0_16 = arith.constant 0 : index
      %17 = vector.load %arg9[%c0_15, %c0_16] : memref<8x128xf32, #tpu.memory_space<vmem>>, vector<8x128xf32>
      tpu.vector_store %arg9[%c0_15, %c0_16], %16 {strides = array<i32>} : memref<8x128xf32, #tpu.memory_space<vmem>>, vector<8x128xf32>,
    } else {
    }
    %c0 = arith.constant 0 : index
    %c0_1 = arith.constant 0 : index
    %3 = vector.load %arg4[%c0, %c0_1] : memref<128x128xf32, #tpu.memory_space<vmem>>, vector<128x128xf32>
    %c0_2 = arith.constant 0 : index
    %c0_3 = arith.constant 0 : index
    %4 = vector.load %arg5[%c0_2, %c0_3] : memref<128x128xf32, #tpu.memory_space<vmem>>, vector<128x128xf32>
    %c0_4 = arith.constant 0 : index
    %c0_5 = arith.constant 0 : index
    %5 = vector.load %arg6[%c0_4, %c0_5] : memref<128x128xf32, #tpu.memory_space<vmem>>, vector<128x128xf32>
    %6 = arith.mulf %4, %5 : vector<128x128xf32>
    %7 = arith.addf %3, %6 : vector<128x128xf32>
    %c0_6 = arith.constant 0 : index
    %c0_7 = arith.constant 0 : index
    %8 = vector.load %arg3[%c0_6, %c0_7] : memref<8x128xf32, #tpu.memory_space<vmem>>, vector<8x128xf32>
    %c0_8 = arith.constant 0 : index
    %c0_9 = arith.constant 0 : index
    %9 = vector.load %arg9[%c0_8, %c0_9] : memref<8x128xf32, #tpu.memory_space<vmem>>, vector<8x128xf32>
    %cst = arith.constant dense<0.000000e+00> : vector<8x128xf32>
    %10 = tpu.matmul %8, %7, %cst {dimension_numbers = #tpu.dot_dimension_numbers<[1], [1], [0], [0], [0, 0, 1, 0], [], []>} : vector<8x128xf32>, vector<128x128xf32>, vector<8x128xf32> -> vector<8x128xf32>
    %11 = arith.addf %9, %10 : vector<8x128xf32>
    %c0_10 = arith.constant 0 : index
    %c0_11 = arith.constant 0 : index
    %12 = vector.load %arg9[%c0_10, %c0_11] : memref<8x128xf32, #tpu.memory_space<vmem>>, vector<8x128xf32>
    tpu.vector_store %arg9[%c0_10, %c0_11], %11 {strides = array<i32>} : memref<8x128xf32, #tpu.memory_space<vmem>>, vector<8x128xf32>,
    %c0_i32_12 = arith.constant 0 : i32
    %13 = arith.cmpi eq, %arg2, %c0_i32_12 : i32
    %14 = arith.extui %13 : i1 to i32
    %c0_i32_13 = arith.constant 0 : i32
    %15 = arith.cmpi ne, %14, %c0_i32_13 : i32
    scf.if %15 {
      %c0_14 = arith.constant 0 : index
      %c0_15 = arith.constant 0 : index
      %16 = vector.load %arg9[%c0_14, %c0_15] : memref<8x128xf32, #tpu.memory_space<vmem>>, vector<8x128xf32>
      %c0_16 = arith.constant 0 : index
      %c0_17 = arith.constant 0 : index
      %17 = vector.load %arg7[%c0_16, %c0_17] : memref<1x128xf32, #tpu.memory_space<vmem>>, vector<1x128xf32>
      %18 = vector.broadcast %17 : vector<1x128xf32> to vector<8x128xf32>
      %19 = arith.addf %16, %18 : vector<8x128xf32>
      %c0_18 = arith.constant 0 : index
      %c0_19 = arith.constant 0 : index
      %20 = vector.load %arg8[%c0_18, %c0_19] : memref<8x128xf32, #tpu.memory_space<vmem>>, vector<8x128xf32>
      tpu.vector_store %arg8[%c0_18, %c0_19], %19 {strides = array<i32>} : memref<8x128xf32, #tpu.memory_space<vmem>>, vector<8x128xf32>,
    } else {
    }
    return
  }
  func.func @transform_0(%arg0: i32, %arg1: i32, %arg2: i32) -> (i32, i32) {
    %c0_i32 = arith.constant 0 : i32
    return %arg0, %arg2 : i32, i32
  }
  func.func @transform_1(%arg0: i32, %arg1: i32, %arg2: i32) -> (i32, i32) {
    %c0_i32 = arith.constant 0 : i32
    return %arg1, %arg2 : i32, i32
  }
  func.func @transform_2(%arg0: i32, %arg1: i32, %arg2: i32) -> (i32, i32) {
    %c0_i32 = arith.constant 0 : i32
    return %arg1, %arg2 : i32, i32
  }
  func.func @transform_3(%arg0: i32, %arg1: i32, %arg2: i32) -> (i32, i32) {
    %c0_i32 = arith.constant 0 : i32
    return %arg1, %arg2 : i32, i32
  }
  func.func @transform_4(%arg0: i32, %arg1: i32, %arg2: i32) -> (i32, i32) {
    %c0_i32 = arith.constant 0 : i32
    %c0_i32_0 = arith.constant 0 : i32
    return %c0_i32, %arg1 : i32, i32
  }
  func.func @transform_5(%arg0: i32, %arg1: i32, %arg2: i32) -> (i32, i32) {
    %c0_i32 = arith.constant 0 : i32
    return %arg0, %arg1 : i32, i32
  }
}

</mosaic_0001>

<bundles_post_ra>
// kernel: tpu_custom_call.1
= control target key start
LH: loop header
LB: loop body
LE: loop exit
PB: predicated region body
PF: predicated region fallthrough
CT: control target
= control target key end

     0   :  { %10 = vsyncpa [#allocation4], 0  ;;  %s411_s0 = inlined_call_operand.hbm [shape: f32[8,128], index: 0, kind: input, shape index: {}]   ;;  %s412_s1 = inlined_call_operand.hbm [shape: f32[128,128], index: 1, kind: input, shape index: {}]   ;;  %s413_s2 = inlined_call_operand.hbm [shape: f32[128,128], index: 2, kind: input, shape index: {}]   ;;  %s414_s3 = inlined_call_operand.hbm [shape: f32[128,128], index: 3, kind: input, shape index: {}]   ;;  %s415_s4 = inlined_call_operand.vmem [shape: f32[1,128], index: 4, kind: input, shape index: {}]   ;;  %s416_s5 = inlined_call_operand.hbm [shape: f32[8,128], index: 5, kind: output, shape index: {}]  }
   0x1   :  { %11 = vsyncpa [#allocation7], 0 }
   0x2   :  { %12 = vsyncpa [#allocation10], 0  ;;  %s29_s20 = sshll.u32 %s412_s1, 4  ;;  %s30_s20 = int_to_ptr.hbm [resolvable:$true] %s29_s20 }
   0x3   :  { %13 = vsyncpa [#allocation5], 0  ;;  %s356_s21 = smov [#allocation6]   ;;  %s19_s25 = sshll.u32 %s411_s0, 4  ;;  %s20_s25 = int_to_ptr.hbm [resolvable:$true] %s19_s25 }
   0x4   :  { %s31_s22 = sshll.u32 %s356_s21, 4  ;;  %s357_s26 = smov 128   ;;  %s32_s22 = int_to_ptr.vmem [resolvable:$true] %s31_s22 }
   0x5   :  { %s358_s27 = smov 8   ;;  %s359_s28 = smov [#allocation3]  }
   0x6   :  { %37 = dma.hbm_to_vmem [thread:$0]  %s30_s20, 2048, %s32_s22, [#allocation7], %s357_s26, %s357_s26, %s358_s27  }
   0x7   :  { %s21_s29 = sshll.u32 %s359_s28, 4  ;;  %s42_s7 = sshll.u32 %s413_s2, 4  ;;  %s22_s29 = int_to_ptr.vmem [resolvable:$true] %s21_s29  ;;  %s43_s7 = int_to_ptr.hbm [resolvable:$true] %s42_s7 }
   0x8   :  { %24 = dma.hbm_to_vmem [thread:$0]  %s20_s25, 128, %s22_s29, [#allocation4]  }
   0x9   :  { %s55_s9 = sshll.u32 %s414_s3, 4  ;;  %s360_s10 = smov [#allocation8]   ;;  %s56_s9 = int_to_ptr.hbm [resolvable:$true] %s55_s9 }
   0xa   :  { %s44_s11 = sshll.u32 %s360_s10, 4  ;;  %s361_s0 = smov [#allocation9]   ;;  %s45_s11 = int_to_ptr.vmem [resolvable:$true] %s44_s11 }
   0xb   :  { %50 = dma.hbm_to_vmem [thread:$0]  %s43_s7, 2048, %s45_s11, [#allocation7], %s357_s26, %s357_s26, %s358_s27  }
   0xc   :  { %s57_s12 = sshll.u32 %s361_s0, 4  ;;  %s58_s12 = int_to_ptr.vmem [resolvable:$true] %s57_s12 }
   0xd   :  { %63 = dma.hbm_to_vmem [thread:$0]  %s56_s9, 2048, %s58_s12, [#allocation10], %s357_s26, %s357_s26, %s358_s27  }
   0xe   :  { %348 = dma.done.wait [#allocation4], 128  }
   0xf   :  { %349 = vsyncadd [#allocation4], 4294967168 }
  0x10   :  { %350 = dma.done.wait [#allocation7], 4096  }
  0x11   :  { %351 = vsyncadd [#allocation7], 4294963200 }
  0x12   :  { %352 = dma.done.wait [#allocation10], 2048  }
  0x13   :  { %353 = vsyncadd [#allocation10], 4294965248  ;;  %v102_v0 = vld [vmem:[#allocation6 + $0x78] sm:$0xff]  ;;  %v117_v4 = vld [vmem:[#allocation8 + $0x70] sm:$0xff]  ;;  %s362_s13 = smov [#allocation11]   ;;  %s208_s17 = sshll.u32 %s416_s5, 4  ;;  %s209_s17 = int_to_ptr.hbm [resolvable:$true] %s208_s17 }
  0x14   :  { %v118_v1 = vld [vmem:[#allocation8 + $0x78] sm:$0xff]  ;;  %v133_v5 = vld [vmem:[#allocation9 + $0x70] sm:$0xff]  ;;  %v116_v8 = vld [vmem:[#allocation8 + $0x68] sm:$0xff]  ;;  %s206_s14 = sshll.u32 %s362_s13, 4  ;;  %s207_s14 = int_to_ptr.vmem [resolvable:$true] %s206_s14 }
  0x15   :  { %v134_v2 = vld [vmem:[#allocation9 + $0x78] sm:$0xff]  ;;  %v101_v6 = vld [vmem:[#allocation6 + $0x70] sm:$0xff]  ;;  %v149_v7 = vmul.f32 %v133_v5, %v117_v4  ;;  %v132_v9 = vld [vmem:[#allocation9 + $0x68] sm:$0xff] }
  0x16   :  { %v150_v3 = vmul.f32 %v134_v2, %v118_v1  ;;  %v148_v12 = vmul.f32 %v132_v9, %v116_v8  ;;  %v100_v13 = vld [vmem:[#allocation6 + $0x68] sm:$0xff]  ;;  %v115_v14 = vld [vmem:[#allocation8 + $0x60] sm:$0xff]  ;;  %v114_v19 = vld [vmem:[#allocation8 + $0x58] sm:$0xff] }
  0x17   :  { %v165_v11 = vadd.f32 %v149_v7, %v101_v6  ;;  %v131_v15 = vld [vmem:[#allocation9 + $0x60] sm:$0xff]  ;;  %v130_v20 = vld [vmem:[#allocation9 + $0x58] sm:$0xff]  ;;  %v113_v24 = vld [vmem:[#allocation8 + $0x50] sm:$0xff] }
  0x18   :  { %v166_v10 = vadd.f32 %v150_v3, %v102_v0  ;;  %v164_v16 = vadd.f32 %v148_v12, %v100_v13  ;;  %v147_v17 = vmul.f32 %v131_v15, %v115_v14  ;;  %v99_v18 = vld [vmem:[#allocation6 + $0x60] sm:$0xff]  ;;  %v146_v22 = vmul.f32 %v130_v20, %v114_v19  ;;  %v98_v23 = vld [vmem:[#allocation6 + $0x58] sm:$0xff]  ;;  %v129_v25 = vld [vmem:[#allocation9 + $0x50] sm:$0xff] }
  0x19   :  { %v145_v27 = vmul.f32 %v129_v25, %v113_v24  ;;  %v97_v28 = vld [vmem:[#allocation6 + $0x50] sm:$0xff]  ;;  %v112_v29 = vld [vmem:[#allocation8 + $0x48] sm:$0xff]  ;;  %v111_v34 = vld [vmem:[#allocation8 + $0x40] sm:$0xff] }
  0x1a   :  { %169 = vmatpush.xpose.msra.mxu0 %v166_v10  ;;  %v163_v21 = vadd.f32 %v147_v17, %v99_v18  ;;  %v162_v26 = vadd.f32 %v146_v22, %v98_v23  ;;  %v128_v30 = vld [vmem:[#allocation9 + $0x48] sm:$0xff]  ;;  %v127_v35 = vld [vmem:[#allocation9 + $0x40] sm:$0xff]  ;;  %v110_v39 = vld [vmem:[#allocation8 + $0x38] sm:$0xff] }
  0x1b   :  { %v161_v31 = vadd.f32 %v145_v27, %v97_v28  ;;  %v144_v32 = vmul.f32 %v128_v30, %v112_v29  ;;  %v96_v33 = vld [vmem:[#allocation6 + $0x48] sm:$0xff]  ;;  %v143_v37 = vmul.f32 %v127_v35, %v111_v34  ;;  %v95_v38 = vld [vmem:[#allocation6 + $0x40] sm:$0xff]  ;;  %v126_v40 = vld [vmem:[#allocation9 + $0x38] sm:$0xff] }
  0x1c   :  { %v142_v42 = vmul.f32 %v126_v40, %v110_v39  ;;  %v94_v43 = vld [vmem:[#allocation6 + $0x38] sm:$0xff]  ;;  %v109_v44 = vld [vmem:[#allocation8 + $0x30] sm:$0xff]  ;;  %v108_v49 = vld [vmem:[#allocation8 + $0x28] sm:$0xff] }
  0x1d   :  { %v160_v36 = vadd.f32 %v144_v32, %v96_v33  ;;  %v159_v41 = vadd.f32 %v143_v37, %v95_v38  ;;  %v125_v45 = vld [vmem:[#allocation9 + $0x30] sm:$0xff]  ;;  %v124_v50 = vld [vmem:[#allocation9 + $0x28] sm:$0xff]  ;;  %v107_v54 = vld [vmem:[#allocation8 + $0x20] sm:$0xff] }
  0x1e   :  { %170 = vmatpush.xpose.msra.mxu0 %v165_v11  ;;  %v158_v46 = vadd.f32 %v142_v42, %v94_v43  ;;  %v141_v47 = vmul.f32 %v125_v45, %v109_v44  ;;  %v93_v48 = vld [vmem:[#allocation6 + $0x30] sm:$0xff]  ;;  %v140_v52 = vmul.f32 %v124_v50, %v108_v49  ;;  %v92_v53 = vld [vmem:[#allocation6 + $0x28] sm:$0xff]  ;;  %v123_v55 = vld [vmem:[#allocation9 + $0x20] sm:$0xff] }
  0x1f   :  { %v139_v57 = vmul.f32 %v123_v55, %v107_v54  ;;  %v91_v58 = vld [vmem:[#allocation6 + $0x20] sm:$0xff]  ;;  %v106_v59 = vld [vmem:[#allocation8 + $0x18] sm:$0xff]  ;;  %v105_v0 = vld [vmem:[#allocation8 + $0x10] sm:$0xff] }
  0x20   :  { %v157_v51 = vadd.f32 %v141_v47, %v93_v48  ;;  %v156_v56 = vadd.f32 %v140_v52, %v92_v53  ;;  %v122_v60 = vld [vmem:[#allocation9 + $0x18] sm:$0xff]  ;;  %v121_v1 = vld [vmem:[#allocation9 + $0x10] sm:$0xff]  ;;  %v104_v5 = vld [vmem:[#allocation8 + $0x8] sm:$0xff] }
  0x21   :  { %v155_v61 = vadd.f32 %v139_v57, %v91_v58  ;;  %v138_v62 = vmul.f32 %v122_v60, %v106_v59  ;;  %v90_v63 = vld [vmem:[#allocation6 + $0x18] sm:$0xff]  ;;  %v137_v3 = vmul.f32 %v121_v1, %v105_v0  ;;  %v89_v4 = vld [vmem:[#allocation6 + $0x10] sm:$0xff]  ;;  %v120_v6 = vld [vmem:[#allocation9 + $0x8] sm:$0xff] }
  0x22   :  { %171 = vmatpush.xpose.msra.mxu0 %v164_v16  ;;  %v136_v8 = vmul.f32 %v120_v6, %v104_v5  ;;  %v88_v9 = vld [vmem:[#allocation6 + $0x8] sm:$0xff]  ;;  %v103_v10 = vld [vmem:[#allocation8] sm:$0xff]  ;;  %v167_v16 = vld [vmem:[#allocation3] sm:$0xff] }
  0x23   :  { %v154_v2 = vadd.f32 %v138_v62, %v90_v63  ;;  %v153_v7 = vadd.f32 %v137_v3, %v89_v4  ;;  %v119_v11 = vld [vmem:[#allocation9] sm:$0xff]  ;;  %v227_v17 = vld [vmem:[%s415_s4] ss:$0 sm:$0xff] }
  0x24   :  { %v152_v12 = vadd.f32 %v136_v8, %v88_v9  ;;  %v135_v13 = vmul.f32 %v119_v11, %v103_v10  ;;  %v87_v14 = vld [vmem:[#allocation6] sm:$0xff] }
  0x26   :  { %172 = vmatpush.xpose.msra.mxu0 %v163_v21  ;;  %v151_v15 = vadd.f32 %v135_v13, %v87_v14 }
  0x2a   :  { %173 = vmatpush.xpose.msra.mxu0 %v162_v26 }
  0x2e   :  { %174 = vmatpush.xpose.msra.mxu0 %v161_v31 }
  0x32   :  { %175 = vmatpush.xpose.msra.mxu0 %v160_v36 }
  0x36   :  { %176 = vmatpush.xpose.msra.mxu0 %v159_v41 }
  0x3a   :  { %177 = vmatpush.xpose.msra.mxu0 %v158_v46 }
  0x3e   :  { %178 = vmatpush.xpose.msra.mxu0 %v157_v51 }
  0x42   :  { %179 = vmatpush.xpose.msra.mxu0 %v156_v56 }
  0x46   :  { %180 = vmatpush.xpose.msra.mxu0 %v155_v61 }
  0x4a   :  { %181 = vmatpush.xpose.msra.mxu0 %v154_v2 }
  0x4e   :  { %182 = vmatpush.xpose.msra.mxu0 %v153_v7 }
  0x52   :  { %183 = vmatpush.xpose.msra.mxu0 %v152_v12 }
  0x56   :  { %184 = vmatpush.xpose.msra.mxu0 %v151_v15 }
  0x59   :  { %185 = vmatmul.f32.vlgmr.msra.gmra.mxu0 %v167_v16 }
  0xd6   :  { %v186_v18 = vpop.f32.mrf.mxu0 }
  0xd7   :  { %v199_v19 = vadd.f32 %v227_v17, %v186_v18 }
  0xd9   :  { %200 = vst [vmem:[#allocation11] sm:$0xff] %v199_v19 }
  0xda   :  { %211 = dma.vmem_to_hbm [thread:$0]  %s207_s14, 128, %s209_s17, [#allocation5]  }
  0xdb   :  { %354 = dma.done.wait [#allocation5], 128  }
  0xdc   :  { %355 = vsyncadd [#allocation5], 4294967168 }
  0xdd   :  { %216 = vsyncpa [#allocation4], 1 }
  0xde   :  { %217 = vsyncpa [#allocation7], 1 }
  0xdf   :  { %218 = vsyncpa [#allocation10], 1 }
  0xe0   :  { %219 = vsyncpa [#allocation5], 1 }

</bundles_post_ra>
